<compile_context>
chip_gen: v6e
topology: v6e:2x2x1
jax: 0.10.0
libtpu: 0.0.40
codegen_flags: <defaults>
</compile_context>

<pallas_src>
import math

import jax
import jax.numpy as jnp
from jax.experimental import pallas as pl
from jax.experimental.pallas import tpu as pltpu

_LANE = 128  # TPU vreg lane width


def _pe_add_kernel(x_ref, pe_ref, o_ref):
    # x_ref : (B, TILE_F) lane-dense tile of the flattened (B, S*D) input
    # pe_ref: (1, TILE_F) matching tile of the flattened positional table
    # o_ref : (B, TILE_F)
    # (1, T) + (B, T): sublane-broadcast add, single VPU op per vreg.
    o_ref[...] = x_ref[...] + pe_ref[...]


def make_positional_encoding(d_model: int, max_len: int = 5000) -> jnp.ndarray:
    """Deterministic pe buffer, identical to the PyTorch __init__ math.

    Also handles odd d_model (the PyTorch original shape-errors there) by
    truncating the cos half to the available columns.
    """
    position = jnp.arange(max_len, dtype=jnp.float32)[:, None]            # (max_len, 1)
    div_term = jnp.exp(
        jnp.arange(0, d_model, 2, dtype=jnp.float32)
        * (-math.log(10000.0) / d_model)
    )                                                                     # (ceil(d/2),)
    args = position * div_term                                            # (max_len, ceil(d/2))
    pe = jnp.zeros((max_len, d_model), dtype=jnp.float32)
    pe = pe.at[:, 0::2].set(jnp.sin(args))
    pe = pe.at[:, 1::2].set(jnp.cos(args)[:, : d_model // 2])
    return pe


def _choose_tile_f(F: int, cols_budget: int) -> int:
    """Pick the lane-tile width for the flattened feature axis.

    Rules (in priority order):
      * last block dim must be a multiple of 128 OR equal the full dim F;
      * if F % 128 == 0, pick a divisor of F (no ragged edge / masked stores);
      * keep the grid >= 2 steps when possible (v7x two-TensorCore sharding);
      * stay within the padded-VMEM column budget.
    """
    if F <= _LANE:
        return F                                   # single full-width block
    if F % _LANE == 0:
        m = F // _LANE
        cap = max(1, min(cols_budget // _LANE, m))
        if m >= 2:
            cap = min(cap, max(1, m // 2))         # guarantee >= 2 grid steps
        for d in range(cap, 0, -1):                # largest divisor of m <= cap
            if m % d == 0:
                return d * _LANE
        return _LANE
    # F not a multiple of 128: lane-aligned tiles, Pallas masks the last block.
    tile = min(cols_budget, (F // _LANE) * _LANE)
    return max(_LANE, tile)


def positional_encoding_forward(x: jnp.ndarray, pe: jnp.ndarray) -> jnp.ndarray:
    """x: (B, S, D), pe: (max_len, D).  Returns x + pe[:S] (eval-mode dropout)."""
    B, S, D = x.shape
    # Glue: slice the table and make the add uniform-dtype (explicit downcast
    # of pe instead of an implicit mixed-precision add inside the kernel).
    pe_slice = pe[:S, :].astype(x.dtype)                                  # (S, D)

    # Lane-dense flattened layout: last dim becomes S*D (>= 128-friendly).
    F = S * D
    x2 = x.reshape(B, F)
    pe2 = pe_slice.reshape(1, F)

    itemsize = jnp.dtype(x.dtype).itemsize
    # Native sublane tile height for this dtype: 8 (f32), 16 (bf16), 32 (i8).
    sub = 8 * max(1, 4 // itemsize)
    rows_x = -(-B // sub) * sub          # padded sublane rows of the x / out blocks
    rows_pe = sub                        # padded sublane rows of the (1, tile_f) pe block
    # Double-buffered *padded* VMEM bytes per lane column of a feature tile
    # (x + out + pe, each double-buffered by the Pallas pipeline).
    bytes_per_col = 2 * (2 * rows_x + rows_pe) * itemsize
    budget_bytes = 12 * 1024 * 1024      # leaves headroom under the 16 MiB v5e default
    cols_budget = max(_LANE, (budget_bytes // bytes_per_col) // _LANE * _LANE)

    tile_f = _choose_tile_f(F, int(cols_budget))
    grid = (pl.cdiv(F, tile_f),)

    # Explicit scoped-VMEM limit derived from the padded footprint (the default
    # would already suffice at this budget, but make the accounting explicit).
    footprint = bytes_per_col * tile_f
    vmem_limit = int(min(32 * 1024 * 1024,
                         max(16 * 1024 * 1024, footprint + (4 << 20))))
    # TODO(synk): for extreme batch sizes the batch axis should be tiled too;
    #             not needed at transformer-typical B.

    cost = pl.CostEstimate(
        flops=B * F,                                    # one add per element
        transcendentals=0,
        bytes_accessed=(2 * B + 1) * F * itemsize,      # read x, write out, read pe once
    )

    out2 = pl.pallas_call(
        _pe_add_kernel,
        out_shape=jax.ShapeDtypeStruct((B, F), x.dtype),
        grid_spec=pltpu.PrefetchScalarGridSpec(
            num_scalar_prefetch=0,
            grid=grid,
            in_specs=[
                pl.BlockSpec((B, tile_f), lambda c: (0, c)),   # whole batch per tile
                pl.BlockSpec((1, tile_f), lambda c: (0, c)),   # pe fetched once per tile
            ],
            out_specs=pl.BlockSpec((B, tile_f), lambda c: (0, c)),
        ),
        compiler_params=pltpu.CompilerParams(
            dimension_semantics=("parallel",),
            vmem_limit_bytes=vmem_limit,
        ),
        cost_estimate=cost,
    )(x2, pe2)

    # No padding was added, so no slice is needed — just reshape the view back.
    out = out2.reshape(B, S, D)
    # Dropout(p=0.1) in eval mode is the identity.
    return out


if __name__ == "__main__":
    key = jax.random.PRNGKey(0)

    # Primary demo shapes (matching the module's usage): B=2, S=8, D=32.
    # S*D = 256 is a multiple of 128 -> tile_f = 128, grid = (2,), all blocks full.
    B, S, D = 2, 8, 32
    MAX_LEN = 64
    x = jax.random.normal(key, (B, S, D), dtype=jnp.float32)
    pe = make_positional_encoding(D, MAX_LEN)

    out = jax.block_until_ready(positional_encoding_forward(x, pe))
    ref = x + pe[:S, :][None, :, :]
    assert out.shape == (B, S, D)
    assert jnp.allclose(out, ref, atol=1e-6), "mismatch vs reference (main)"

    # Secondary check: S*D = 192 is NOT a multiple of 128 -> exercises the
    # ragged last block (no wrapper pad / output-slice copies anymore).
    B2, S2, D2 = 2, 8, 24
    x2 = jax.random.normal(jax.random.PRNGKey(1), (B2, S2, D2), dtype=jnp.float32)
    pe2 = make_positional_encoding(D2, MAX_LEN)
    out2 = jax.block_until_ready(positional_encoding_forward(x2, pe2))
    ref2 = x2 + pe2[:S2, :][None, :, :]
    assert jnp.allclose(out2, ref2, atol=1e-6), "mismatch vs reference (ragged)"

    print("KERNEL_OK")
</pallas_src>

<mosaic_0001>
module attributes {stable_mosaic.version = 11 : i64} {
  func.func @_pe_add_kernel(%arg0: i32, %arg1: memref<2x128xf32, #tpu.memory_space<vmem>>, %arg2: memref<1x128xf32, #tpu.memory_space<vmem>>, %arg3: memref<2x128xf32, #tpu.memory_space<vmem>>) attributes {dimension_semantics = [#tpu.dimension_semantics<parallel>], iteration_bounds = array<i64: 2>, scalar_prefetch = 0 : i64, scratch_operands = 0 : i64, tpu.core_type = #tpu.core_type<tc>, window_params = [{transform_indices = @transform_0, window_bounds = array<i64: 2, 128>}, {transform_indices = @transform_1, window_bounds = array<i64: 1, 128>}, {transform_indices = @transform_2, window_bounds = array<i64: 2, 128>}]} {
    %c0 = arith.constant 0 : index
    %c0_0 = arith.constant 0 : index
    %0 = vector.load %arg1[%c0, %c0_0] : memref<2x128xf32, #tpu.memory_space<vmem>>, vector<2x128xf32>
    %c0_1 = arith.constant 0 : index
    %c0_2 = arith.constant 0 : index
    %1 = vector.load %arg2[%c0_1, %c0_2] : memref<1x128xf32, #tpu.memory_space<vmem>>, vector<1x128xf32>
    %2 = vector.broadcast %1 : vector<1x128xf32> to vector<2x128xf32>
    %3 = arith.addf %0, %2 : vector<2x128xf32>
    %c0_3 = arith.constant 0 : index
    %c0_4 = arith.constant 0 : index
    %4 = vector.load %arg3[%c0_3, %c0_4] : memref<2x128xf32, #tpu.memory_space<vmem>>, vector<2x128xf32>
    tpu.vector_store %arg3[%c0_3, %c0_4], %3 {strides = array<i32>} : memref<2x128xf32, #tpu.memory_space<vmem>>, vector<2x128xf32>,
    return
  }
  func.func @transform_0(%arg0: i32) -> (i32, i32) {
    %c0_i32 = arith.constant 0 : i32
    %c0_i32_0 = arith.constant 0 : i32
    return %c0_i32, %arg0 : i32, i32
  }
  func.func @transform_1(%arg0: i32) -> (i32, i32) {
    %c0_i32 = arith.constant 0 : i32
    %c0_i32_0 = arith.constant 0 : i32
    return %c0_i32, %arg0 : i32, i32
  }
  func.func @transform_2(%arg0: i32) -> (i32, i32) {
    %c0_i32 = arith.constant 0 : i32
    %c0_i32_0 = arith.constant 0 : i32
    return %c0_i32, %arg0 : i32, i32
  }
}

</mosaic_0001>

<bundles_post_ra>
// kernel: tpu_custom_call.1
= control target key start
LH: loop header
LB: loop body
LE: loop exit
PB: predicated region body
PF: predicated region fallthrough
CT: control target
= control target key end

     0   :  { %7 = vsyncpa [#allocation3], 0  ;;  %s705_s0 = inlined_call_operand.hbm [shape: f32[2,256], index: 0, kind: input, shape index: {}]   ;;  %s706_s1 = inlined_call_operand.hbm [shape: f32[1,256], index: 1, kind: input, shape index: {}]   ;;  %s707_s2 = inlined_call_operand.hbm [shape: f32[2,256], index: 2, kind: output, shape index: {}]  }
   0x1   :  { %9 = vsyncpa [#allocation3 + $0x1], 0 }
   0x2   :  { %10 = vsyncpa [#allocation6], 0 }
   0x3   :  { %12 = vsyncpa [#allocation6 + $0x1], 0 }
   0x4   :  { %13 = vsyncpa [#allocation4], 0 }
   0x5   :  { %15 = vsyncpa [#allocation4 + $0x1], 0  ;;  %s516_s9 = smov 0   ;;  %s518_s10 = smov 0  }
   0x6   :  { %s520_s11 = smov 0   ;;  %s522_s12 = smov 0  }
   0x7 LB: > { %s537_s13 = sadd.s32 4294967295, %s496_s12   ;;  %s307_s14 = sadd.s32 4294967294, %s496_s12   ;;  %s496_s12 = sphi %s522_s12, %s726_s12   ;;  %s492_s11 = sphi %s520_s11, %s725_s11   ;;  %s488_s10 = sphi %s518_s10, %s724_s10   ;;  %s484_s9 = sphi %s516_s9, %s723_s9  }
   0x8   : > { %s541_s15 = sadd.s32 1, %s496_s12   ;;  %s28_s16 = sadd.s32 1, %s492_s11 }
   0x9   : > { %s25_s17 = ssub.s32 %s496_s12, %s541_s15  ;;  %p35_p0 = scmp.ne.s32.totalorder %s492_s11, %s488_s10 }
   0xa   : > { %p26_p1 = scmp.eq.s32.totalorder %s25_s17, 0  ;;  %p36_p2 = scmp.eq.s32.totalorder %s496_s12, 0 }
   0xb   : > { %p41_p3 = scmp.ne.s32.totalorder %s488_s10, %s484_s9  ;;  %p42_p4 = scmp.eq.s32.totalorder %s537_s13, 0 }
   0xc   : > { %s553_s18 = scalar_select %p26_p1, %s492_s11, %s28_s16  }
   0xd   : > { %p555_p5 = por %p36_p2, %p35_p0  ;;  %p559_p6 = por %p42_p4, %p41_p3 }
   0xe   : > { %p91_p7 = scmp.eq.s32.totalorder %s537_s13, 1  ;;  %p97_p8 = scmp.eq.s32.totalorder %s307_s14, 1 }
   0xf   : > { %s711_s20 = scalar_select %p559_p6, 1, 0 }
  0x10   : > { %p338_p10 = scmp.lt.s32.totalorder %s496_s12, 2  ;;  %p566_p11 = por %p91_p7, %p35_p0 }
  0x11   : > { %p570_p12 = por %p97_p8, %p41_p3  ;;  %s575_s23 = sand.u32 1, %s492_s11  }
  0x12   : > { %s712_s21 = scalar_select %p566_p11, 1, 0 }
  0x13   : > { %s713_s22 = scalar_select %p570_p12, 1, 0 }
  0x14   : > { %s311_s24 = sshll.u32 %s496_s12, 5  ;;  %s310_s25 = sshll.u32 %s575_s23, 1 }
  0x15   : > { %s582_s28 = scalar_lea.hbm %s705_s0, %s311_s24  ;;  %s121_s29 = scalar_lea.vmem [#allocation2], %s310_s25 }
  0x16   : > { %s128_s30 = sshll.u32 %s121_s29, 4  ;;  %p586_p13 = pnand %p338_p10, %p555_p5  ;;  %s590_s30 = int_to_ptr.vmem [resolvable:$true] %s128_s30 }
  0x17   : > { %s118_s4 = scalar_lea.sflag [#allocation3], %s575_s23  ;;  %s372_s5 = scalar_lea.hbm %s582_s28, 32 }
  0x18   : > { %p373_p2 = scmp.ne.s32.totalorder %s582_s28, %s372_s5  ;;  %p374_p3 = pneg %p586_p13 }
  0x19   : > { %s377_s8 = scalar_lea.hbm %s705_s0, 64  ;;  %p378_p5 = scmp.lt.s32.totalorder %s582_s28, %s705_s0 }
  0x1a   : > { %p375_p4 = pnand %p374_p3, %p373_p2  ;;  %p379_p8 = scmp.lt.s32.totalorder %s377_s8, %s372_s5 }
  0x1c   : > { %p376_p7 = pneg %p375_p4  ;;  %p380_p10 = por %p379_p8, %p378_p5 }
  0x1e   : > { %p381_p9 = pnand %p380_p10, %p376_p7 }
  0x20   : > { %384 = shalt.err (!%p381_p9)
}
  0x21   : > { %s385_s17 = scalar_lea.vmem %s590_s30, 32  ;;  %s498_s19 = smov [#allocation2]  }
  0x22   : > { %p386_p0 = scmp.ne.s32.totalorder %s590_s30, %s385_s17  ;;  %s390_s24 = sshll.u32 %s498_s19, 4  ;;  %s391_s24 = int_to_ptr.vmem [resolvable:$false] %s390_s24 }
  0x23   : > { %s392_s25 = scalar_lea.vmem %s391_s24, 64  ;;  %p393_p1 = scmp.lt.s32.totalorder %s590_s30, %s391_s24 }
  0x24   : > { %p388_p2 = pnand %p386_p0, %p374_p3  ;;  %p394_p12 = scmp.lt.s32.totalorder %s392_s25, %s385_s17 }
  0x26   : > { %p389_p4 = pneg %p388_p2  ;;  %p395_p11 = por %p394_p12, %p393_p1 }
  0x28   : > { %p396_p5 = pnand %p395_p11, %p389_p4 }
  0x2a   : > { %399 = shalt.err (!%p396_p5)
}
  0x2b   : > { %330 = dma.hbm_to_vmem [thread:$0]  (!%p586_p13), %s582_s28, 32, %s590_s30, %s118_s4  }
  0x2c   : > { %p715_p9 = scmp.lt.s32.totalorder %s496_s12, 3  ;;  %p716_p0 = scmp.ge.s32.totalorder %s496_s12, 1 }
  0x2d   : > { %s312_s27 = sshll.u32 %s496_s12, 4  ;;  %s138_s7 = scalar_lea.vmem [#allocation5], %s575_s23 }
  0x2e   : > { %p623_p7 = pnand %p716_p0, %p715_p9  ;;  %s631_s6 = scalar_lea.hbm %s706_s1, %s312_s27 }
  0x2f   : > { %s145_s8 = sshll.u32 %s138_s7, 4  ;;  %s136_s14 = scalar_lea.sflag [#allocation6], %s575_s23  ;;  %s146_s8 = int_to_ptr.vmem [resolvable:$true] %s145_s8 }
  0x30   : > { %s717_s26 = scalar_select %p623_p7, 1, 0 }
  0x31   : > { %s400_s28 = scalar_lea.hbm %s631_s6, 16  ;;  %s405_s16 = scalar_lea.hbm %s706_s1, 32 }
  0x32   : > { %p401_p11 = scmp.ne.s32.totalorder %s631_s6, %s400_s28  ;;  %p406_p8 = scmp.lt.s32.totalorder %s631_s6, %s706_s1 }
  0x33   : > { %p407_p10 = scmp.lt.s32.totalorder %s405_s16, %s400_s28 }
  0x34   : > { %p403_p12 = pnand %p401_p11, %p374_p3 }
  0x35   : > { %p408_p2 = por %p407_p10, %p406_p8 }
  0x36   : > { %p404_p1 = pneg %p403_p12 }
  0x38   : > { %p409_p4 = pnand %p408_p2, %p404_p1 }
  0x3a   : > { %412 = shalt.err (!%p409_p4)
}
  0x3b   : > { %s413_s24 = scalar_lea.vmem %s146_s8, 16  ;;  %s499_s23 = smov [#allocation5]  }
  0x3c   : > { %p414_p5 = scmp.ne.s32.totalorder %s146_s8, %s413_s24  ;;  %s418_s25 = sshll.u32 %s499_s23, 4  ;;  %s419_s25 = int_to_ptr.vmem [resolvable:$false] %s418_s25 }
  0x3d   : > { %s420_s27 = scalar_lea.vmem %s419_s25, 32  ;;  %p421_p11 = scmp.lt.s32.totalorder %s146_s8, %s419_s25 }
  0x3e   : > { %p416_p9 = pnand %p414_p5, %p374_p3  ;;  %p422_p12 = scmp.lt.s32.totalorder %s420_s27, %s413_s24 }
  0x40   : > { %p417_p0 = pneg %p416_p9  ;;  %p423_p6 = por %p422_p12, %p421_p11 }
  0x42   : > { %p424_p7 = pnand %p423_p6, %p417_p0 }
  0x44   : > { %427 = shalt.err (!%p424_p7)
}
  0x45   : > { %333 = dma.hbm_to_vmem [thread:$0]  (!%p586_p13), %s631_s6, 16, %s146_s8, %s136_s14  }
  0x46   : > { %p718_p1 = scmp.ne.s32.totalorder %s717_s26, 0 }
  0x47   : > { %s656_s29 = sand.u32 (!%p718_p1), 1, %s488_s10   ;;  %p719_p3 = scmp.ne.s32.totalorder (!%p718_p1), %s711_s20, 0 }
  0x48   : > { %154 = sbr.rel (%p718_p1) target bundleno = 105 (0x69), region = 28  ;;  %s314_s5 = sshll.u32 (!%p718_p1), %s656_s29, 1 }
  0x49   : > { %s157_s7 = scalar_lea.sflag (!%p718_p1), [#allocation3], %s656_s29  ;;  %s160_s28 = scalar_lea.vmem (!%p718_p1), [#allocation2], %s314_s5 }
  0x4d   : > { %471 = dma.done.wait (%p719_p3), %s157_s7, 32  }
  0x4e   : > { %473 = vsyncadd (%p719_p3), %s157_s7, 4294967264  ;;  %s166_s3 = scalar_lea.sflag [#allocation6], %s656_s29  ;;  %s168_s26 = scalar_lea.vmem [#allocation5], %s656_s29 }
  0x4f   : > { %475 = dma.done.wait (%p719_p3), %s166_s3, 16  }
  0x50   : > { %477 = vsyncadd (%p719_p3), %s166_s3, 4294967280  ;;  %s192_s6 = scalar_lea.vmem [#allocation7], %s314_s5  ;;  %s318_s14 = sshll.u32 %s537_s13, 5  ;;  %v193_v0 = vld [vmem:[%s160_s28] sm:$0x3] }
  0x51   : > { %s217_s8 = sshll.u32 %s192_s6, 4  ;;  %v316_v1 = vld [vmem:[%s168_s26] ss:$0 sm:$0xff]  ;;  %s215_s16 = scalar_lea.hbm %s707_s2, %s318_s14  ;;  %s218_s8 = int_to_ptr.vmem [resolvable:$true] %s217_s8 }
  0x52   : > { %v201_v2 = vadd.f32 %v316_v1, %v193_v0  ;;  %s204_s17 = scalar_lea.sflag [#allocation4], %s656_s29  ;;  %s428_s19 = scalar_lea.vmem %s218_s8, 32 }
  0x53   : > { %p429_p6 = scmp.ne.s32.totalorder %s218_s8, %s428_s19  ;;  %p720_p13 = scmp.ne.s32.totalorder %s712_s21, 0 }
  0x54   : > { %202 = vst [vmem:[%s192_s6] sm:$0x3] %v201_v2  ;;  %s500_s20 = smov [#allocation7]  }
  0x55   : > { %p430_p7 = pnand %p429_p6, %p720_p13  ;;  %s432_s24 = sshll.u32 %s500_s20, 4  ;;  %s433_s24 = int_to_ptr.vmem [resolvable:$false] %s432_s24 }
  0x56   : > { %s434_s23 = scalar_lea.vmem %s433_s24, 64  ;;  %p435_p10 = scmp.lt.s32.totalorder %s218_s8, %s433_s24 }
  0x57   : > { %p431_p8 = pneg %p430_p7  ;;  %p436_p2 = scmp.lt.s32.totalorder %s434_s23, %s428_s19 }
  0x59   : > { %p437_p4 = por %p436_p2, %p435_p10 }
  0x5b   : > { %p438_p5 = pnand %p437_p4, %p431_p8 }
  0x5d   : > { %441 = shalt.err (!%p438_p5)
}
  0x5e   : > { %s442_s13 = scalar_lea.hbm %s215_s16, 32  ;;  %s446_s29 = scalar_lea.hbm %s707_s2, 64 }
  0x5f   : > { %p443_p9 = scmp.ne.s32.totalorder %s215_s16, %s442_s13  ;;  %p447_p12 = scmp.lt.s32.totalorder %s215_s16, %s707_s2 }
  0x60   : > { %p448_p1 = scmp.lt.s32.totalorder %s446_s29, %s442_s13 }
  0x61   : > { %p444_p0 = pnand %p443_p9, %p720_p13 }
  0x62   : > { %p449_p3 = por %p448_p1, %p447_p12 }
  0x63   : > { %p445_p11 = pneg %p444_p0 }
  0x65   : > { %p450_p6 = pnand %p449_p3, %p445_p11 }
  0x67   : > { %453 = shalt.err (!%p450_p6)
}
  0x68   : > { %325 = dma.vmem_to_hbm [thread:$0]  (%p720_p13), %s218_s8, 32, %s215_s16, %s204_s17  }
  0x69 PF: > { %s229_s28 = sand.u32 1, %s484_s9   ;;  %p721_p7 = scmp.ne.s32.totalorder %s713_s22, 0 }
  0x6a   : > { %p722_p8 = scmp.ge.s32.totalorder %s496_s12, 2  ;;  %s230_s3 = scalar_lea.sflag [#allocation4], %s229_s28 }
  0x6c   : > { %p335_p10 = pnand %p722_p8, %p721_p7 }
  0x6e   : > { %p336_p2 = pneg %p335_p10 }
  0x70   : > { %479 = dma.done.wait (%p336_p2), %s230_s3, 32  }
  0x71   : > { %481 = vsyncadd (%p336_p2), %s230_s3, 4294967264  ;;  %p18_p4 = scmp.ge.s32.totalorder %s541_s15, 4   ;;  %s723_s9 = smov %s488_s10 }
  0x72   : > { %s724_s10 = smov %s492_s11  ;;  %s725_s11 = smov %s553_s18 }
  0x73   : > { %s726_s12 = smov %s541_s15  ;;  %20 = sbr.rel (!%p18_p4) target bundleno = 7 (0x7), region = 86 }
  0x78   :  { %235 = vsyncpa [#allocation3], 1 }
  0x79   :  { %237 = vsyncpa [#allocation3 + $0x1], 1 }
  0x7a   :  { %238 = vsyncpa [#allocation6], 1 }
  0x7b   :  { %240 = vsyncpa [#allocation6 + $0x1], 1 }
  0x7c   :  { %241 = vsyncpa [#allocation4], 1 }
  0x7d   :  { %243 = vsyncpa [#allocation4 + $0x1], 1 }

</bundles_post_ra>
